<compile_context>
chip_gen: v7x
topology: tpu7x:2x2x1
jax: 0.10.0
libtpu: 0.0.40
codegen_flags: <defaults>
</compile_context>

<pallas_src>
import jax
import jax.numpy as jnp
import numpy as np
from jax import lax
from jax.experimental import pallas as pl
from jax.experimental.pallas import tpu as pltpu


def _round_up(x, m):
    return ((x + m - 1) // m) * m


def _vmem_capacity_bytes():
    try:
        return int(pltpu.get_tpu_info().vmem_capacity_bytes)
    except Exception:
        return 64 * 1024 * 1024  # conservative default (v7x per-TC VMEM)


# ---------------------------------------------------------------------------
# One-time capability probe: is pipeline_mode=pl.Buffered(1) supported for a
# stationary pallas_call input?  Probed eagerly (never under jit) and cached.
# ---------------------------------------------------------------------------
_BUFFERED_OK = None


def _buffered_single_supported():
    global _BUFFERED_OK
    if _BUFFERED_OK is None:
        def _probe_kernel(x_ref, o_ref):
            o_ref[...] = x_ref[...]

        try:
            x = jnp.arange(8 * 128, dtype=jnp.float32).reshape(8, 128)
            out = pl.pallas_call(
                _probe_kernel,
                grid=(1,),
                in_specs=[pl.BlockSpec((8, 128), lambda i: (0, 0),
                                       pipeline_mode=pl.Buffered(1))],
                out_specs=pl.BlockSpec((8, 128), lambda i: (0, 0)),
                out_shape=jax.ShapeDtypeStruct((8, 128), jnp.float32),
            )(x)
            jax.block_until_ready(out)
            _BUFFERED_OK = bool(jnp.array_equal(out, x))
        except Exception:
            _BUFFERED_OK = False
    return _BUFFERED_OK


# ---------------------------------------------------------------------------
# Path 1: VMEM-resident table, one-hot MXU gather (small/medium vocab).
# ---------------------------------------------------------------------------
def _glove_onehot_kernel(idx_ref, tab_ref, out_ref):
    """Gather rows of the fused [embedding | b | c] table via a one-hot matmul.

    idx_ref: (T, 1)      int32  token ids for this tile
    tab_ref: (3*Vp, W)   bf16   stacked hi/mid/lo bf16 split of the f32 table
                                (stationary; single-buffered when supported)
    out_ref: (T, W)      f32    gathered rows (lane-dense)
    """
    t = idx_ref.shape[0]
    v_pad = tab_ref.shape[0] // 3

    idx = idx_ref[...]                                              # (T, 1)
    lane = lax.broadcasted_iota(jnp.int32, (t, v_pad), 1)
    onehot = (lane == idx).astype(jnp.bfloat16)                     # (T, Vp)
    # "Three-hot" against the stacked hi/mid/lo planes: the MXU f32 accumulator
    # sums hi + mid + lo, reconstructing the f32 row (~0.5 ulp) with 3 native
    # bf16 passes instead of the 6-pass f32 HIGHEST decomposition.
    onehot3 = jnp.concatenate([onehot, onehot, onehot], axis=1)     # (T, 3Vp)
    out_ref[...] = jnp.dot(onehot3, tab_ref[...],
                           preferred_element_type=jnp.float32)


def _onehot_call(idx_flat, tab_split, *, n, v_pad, width, tile, cap, buffered_ok):
    n_pad = _round_up(max(n, 1), tile)
    idx2d = jnp.zeros((n_pad, 1), jnp.int32).at[:n, 0].set(idx_flat)
    grid = (n_pad // tile,)

    # VMEM budget: table (x1 if single-buffered, else x2), one-hot temporaries
    # (i32 iota + bf16 onehot + bf16 three-hot), double-buffered idx/out blocks.
    tab_bytes = tab_split.size * tab_split.dtype.itemsize * (1 if buffered_ok else 2)
    onehot_bytes = tile * v_pad * 12
    io_bytes = 2 * (tile * width * 4) + 2 * (tile * 128 * 4)
    vmem_est = tab_bytes + onehot_bytes + io_bytes + (4 << 20)
    vmem_limit = int(min(max(vmem_est, 32 << 20), int(0.9 * cap)))

    tab_kwargs = {"pipeline_mode": pl.Buffered(1)} if buffered_ok else {}
    tab_spec = pl.BlockSpec((tab_split.shape[0], tab_split.shape[1]),
                            lambda t: (0, 0), **tab_kwargs)

    return pl.pallas_call(
        _glove_onehot_kernel,
        grid=grid,
        in_specs=[
            pl.BlockSpec((tile, 1), lambda t: (t, 0)),   # token ids
            tab_spec,                                    # stationary fused table
        ],
        out_specs=pl.BlockSpec((tile, width), lambda t: (t, 0)),
        out_shape=jax.ShapeDtypeStruct((n_pad, width), jnp.float32),
        compiler_params=pltpu.CompilerParams(
            dimension_semantics=("parallel",),           # independent token tiles
            vmem_limit_bytes=vmem_limit,
        ),
    )(idx2d, tab_split)


# ---------------------------------------------------------------------------
# Path 2: scalar-prefetch row gather (large vocab; table never VMEM-resident).
# ---------------------------------------------------------------------------
def _glove_rowgather_kernel(ids_ref, row_ref, out_ref):
    # ids_ref (scalar prefetch, SMEM) is consumed by the index_maps only.
    del ids_ref
    out_ref[...] = row_ref[...]


def _rowgather_call(idx_flat, tab_f32, *, n, width):
    # TODO(synk): gather a block of rows per step via manual double-buffered
    #             make_async_copy to amortize per-step overhead further.
    return pl.pallas_call(
        _glove_rowgather_kernel,
        grid_spec=pltpu.PrefetchScalarGridSpec(
            num_scalar_prefetch=1,
            grid=(n,),
            in_specs=[pl.BlockSpec((1, width), lambda i, ids: (ids[i], 0))],
            out_specs=pl.BlockSpec((1, width), lambda i, ids: (i, 0)),
        ),
        out_shape=jax.ShapeDtypeStruct((n, width), jnp.float32),
        compiler_params=pltpu.CompilerParams(
            dimension_semantics=("arbitrary",),
        ),
    )(idx_flat, tab_f32)


# ---------------------------------------------------------------------------
# Parameter preparation (hoisted out of the per-call path) + jitted forward.
# ---------------------------------------------------------------------------
def make_glove_embedding(weight, b, c, *, force_row_gather=False):
    weight = jnp.asarray(weight, jnp.float32)
    b = jnp.asarray(b, jnp.float32)
    c = jnp.asarray(c, jnp.float32)
    v, d = weight.shape

    d_pad = _round_up(d, 128)
    if d_pad - d >= 2:                       # reuse lane-padding slack for b, c
        b_col, c_col, width = d, d + 1, d_pad
    else:                                    # add one extra 128-lane group
        b_col, c_col, width = d_pad, d_pad + 1, d_pad + 128
    v_pad = _round_up(v, 128)

    # Fused padded table: [embedding | b | c], built once.
    fused = jnp.zeros((v_pad, width), jnp.float32)
    fused = fused.at[:v, :d].set(weight)
    fused = fused.at[:v, b_col].set(b)
    fused = fused.at[:v, c_col].set(c)

    cap = _vmem_capacity_bytes()
    buffered_ok = _buffered_single_supported()
    split_bytes = 3 * v_pad * width * 2 * (1 if buffered_ok else 2)
    use_onehot = (not force_row_gather) and (split_bytes < 0.4 * cap)

    if use_onehot:
        # Exact-ish 3-way bf16 split of the f32 table (hi + mid + lo ~= x).
        hi = fused.astype(jnp.bfloat16)
        r1 = fused - hi.astype(jnp.float32)
        mid = r1.astype(jnp.bfloat16)
        lo = (r1 - mid.astype(jnp.float32)).astype(jnp.bfloat16)
        table = jnp.concatenate([hi, mid, lo], axis=0)      # (3*Vp, W) bf16
    else:
        table = fused                                       # (Vp, W) f32

    def _forward(x, tab):
        orig_shape = x.shape
        # TODO(synk): PyTorch nn.Embedding raises on out-of-range ids; we clamp.
        idx = jnp.clip(x.reshape(-1).astype(jnp.int32), 0, v - 1)
        n = idx.shape[0]

        if use_onehot:
            if n >= 128:
                tile = 128
                for cand in (512, 256):                      # fill the 256-wide MXU
                    if n >= cand and (cand * v_pad * 12 + 2 * cand * width * 4) < 0.25 * cap:
                        tile = cand
                        break
            else:
                tile = max(8, _round_up(n, 8))
            out = _onehot_call(idx, tab, n=n, v_pad=v_pad, width=width,
                               tile=tile, cap=cap, buffered_ok=buffered_ok)
        else:
            out = _rowgather_call(idx, tab, n=n, width=width)

        y = out[:n, :d].reshape(orig_shape + (d,))
        b_out = out[:n, b_col].reshape(orig_shape)
        c_out = out[:n, c_col].reshape(orig_shape)
        return y, b_out, c_out

    fwd = jax.jit(_forward)
    return lambda x: fwd(x, table)


if __name__ == "__main__":
    num_embeddings = 32
    embedding_dim = 128
    B, S = 2, 8

    key = jax.random.PRNGKey(0)
    k_w, k_b, k_c, k_x = jax.random.split(key, 4)

    # nn.Embedding default init: N(0, 1); b, c: N(0, 0.01).
    weight = jax.random.normal(k_w, (num_embeddings, embedding_dim), dtype=jnp.float32)
    b = 0.01 * jax.random.normal(k_b, (num_embeddings,), dtype=jnp.float32)
    c = 0.01 * jax.random.normal(k_c, (num_embeddings,), dtype=jnp.float32)
    x = jax.random.randint(k_x, (B, S), 0, num_embeddings, dtype=jnp.int32)

    y_ref = weight[x]
    b_ref = b[x]
    c_ref = c[x]

    # Path 1: VMEM-resident fused table, one-hot MXU gather (default, small vocab).
    fwd = make_glove_embedding(weight, b, c)
    y, b_out, c_out = fwd(x)
    jax.block_until_ready((y, b_out, c_out))
    np.testing.assert_allclose(np.asarray(y), np.asarray(y_ref), rtol=1e-6, atol=1e-6)
    np.testing.assert_allclose(np.asarray(b_out), np.asarray(b_ref), rtol=1e-6, atol=1e-6)
    np.testing.assert_allclose(np.asarray(c_out), np.asarray(c_ref), rtol=1e-6, atol=1e-6)

    # Path 2: scalar-prefetch row gather (the large-vocab path), forced here to
    # exercise it at small shapes.  Row gather is a bit-exact copy.
    fwd_rg = make_glove_embedding(weight, b, c, force_row_gather=True)
    y2, b2, c2 = fwd_rg(x)
    jax.block_until_ready((y2, b2, c2))
    np.testing.assert_allclose(np.asarray(y2), np.asarray(y_ref), rtol=1e-6, atol=1e-6)
    np.testing.assert_allclose(np.asarray(b2), np.asarray(b_ref), rtol=1e-6, atol=1e-6)
    np.testing.assert_allclose(np.asarray(c2), np.asarray(c_ref), rtol=1e-6, atol=1e-6)

    print("KERNEL_OK")
</pallas_src>

<mosaic_0001>
module attributes {stable_mosaic.version = 11 : i64} {
  func.func @_probe_kernel(%arg0: i32, %arg1: memref<8x128xf32, #tpu.memory_space<vmem>>, %arg2: memref<8x128xf32, #tpu.memory_space<vmem>>) attributes {dimension_semantics = [#tpu.dimension_semantics<arbitrary>], iteration_bounds = array<i64: 1>, scalar_prefetch = 0 : i64, scratch_operands = 0 : i64, tpu.core_type = #tpu.core_type<tc>, window_params = [{pipeline_mode = #tpu.pipeline_mode<synchronous>, transform_indices = @transform_0, window_bounds = array<i64: 8, 128>}, {pipeline_mode = #tpu.pipeline_mode<synchronous>, transform_indices = @transform_1, window_bounds = array<i64: 8, 128>}]} {
    %c0 = arith.constant 0 : index
    %c0_0 = arith.constant 0 : index
    %0 = vector.load %arg1[%c0, %c0_0] : memref<8x128xf32, #tpu.memory_space<vmem>>, vector<8x128xf32>
    %c0_1 = arith.constant 0 : index
    %c0_2 = arith.constant 0 : index
    %1 = vector.load %arg2[%c0_1, %c0_2] : memref<8x128xf32, #tpu.memory_space<vmem>>, vector<8x128xf32>
    tpu.vector_store %arg2[%c0_1, %c0_2], %0 {strides = array<i32>} : memref<8x128xf32, #tpu.memory_space<vmem>>, vector<8x128xf32>,
    return
  }
  func.func @transform_0(%arg0: i32) -> (i32, i32) {
    %c0_i32 = arith.constant 0 : i32
    %c0_i32_0 = arith.constant 0 : i32
    %c0_i32_1 = arith.constant 0 : i32
    return %c0_i32, %c0_i32_0 : i32, i32
  }
  func.func @transform_1(%arg0: i32) -> (i32, i32) {
    %c0_i32 = arith.constant 0 : i32
    %c0_i32_0 = arith.constant 0 : i32
    %c0_i32_1 = arith.constant 0 : i32
    return %c0_i32, %c0_i32_0 : i32, i32
  }
}

module attributes {stable_mosaic.version = 11 : i64} {
  func.func @_glove_onehot_kernel(%arg0: i32, %arg1: memref<16x1xi32, #tpu.memory_space<vmem>>, %arg2: memref<384x256xbf16, #tpu.memory_space<vmem>>, %arg3: memref<16x256xf32, #tpu.memory_space<vmem>>) attributes {dimension_semantics = [#tpu.dimension_semantics<parallel>], iteration_bounds = array<i64: 1>, scalar_prefetch = 0 : i64, scratch_operands = 0 : i64, tpu.core_type = #tpu.core_type<tc>, window_params = [{transform_indices = @transform_0, window_bounds = array<i64: 16, 1>}, {pipeline_mode = #tpu.pipeline_mode<synchronous>, transform_indices = @transform_1, window_bounds = array<i64: 384, 256>}, {transform_indices = @transform_2, window_bounds = array<i64: 16, 256>}]} {
    %c0 = arith.constant 0 : index
    %c0_0 = arith.constant 0 : index
    %0 = vector.load %arg1[%c0, %c0_0] : memref<16x1xi32, #tpu.memory_space<vmem>>, vector<16x1xi32>
    %1 = tpu.iota {dimensions = array<i32: 1>} : vector<16x128xi32>
    %2 = vector.broadcast %0 : vector<16x1xi32> to vector<16x128xi32>
    %3 = arith.cmpi eq, %1, %2 : vector<16x128xi32>
    %4 = arith.extui %3 : vector<16x128xi1> to vector<16x128xi32>
    %5 = arith.sitofp %4 : vector<16x128xi32> to vector<16x128xf32>
    %6 = arith.truncf %5 : vector<16x128xf32> to vector<16x128xbf16>
    %7 = tpu.concatenate %6, %6, %6 in 1 : vector<16x128xbf16>, vector<16x128xbf16>, vector<16x128xbf16> -> vector<16x384xbf16>
    %c0_1 = arith.constant 0 : index
    %c0_2 = arith.constant 0 : index
    %8 = vector.load %arg2[%c0_1, %c0_2] : memref<384x256xbf16, #tpu.memory_space<vmem>>, vector<384x256xbf16>
    %cst = arith.constant dense<0.000000e+00> : vector<16x256xf32>
    %9 = tpu.matmul %7, %8, %cst {dimension_numbers = #tpu.dot_dimension_numbers<[1], [0], [0], [1], [0, 0, 1, 1], [], []>} : vector<16x384xbf16>, vector<384x256xbf16>, vector<16x256xf32> -> vector<16x256xf32>
    %c0_3 = arith.constant 0 : index
    %c0_4 = arith.constant 0 : index
    %10 = vector.load %arg3[%c0_3, %c0_4] : memref<16x256xf32, #tpu.memory_space<vmem>>, vector<16x256xf32>
    tpu.vector_store %arg3[%c0_3, %c0_4], %9 {strides = array<i32>} : memref<16x256xf32, #tpu.memory_space<vmem>>, vector<16x256xf32>,
    return
  }
  func.func @transform_0(%arg0: i32) -> (i32, i32) {
    %c0_i32 = arith.constant 0 : i32
    %c0_i32_0 = arith.constant 0 : i32
    return %arg0, %c0_i32 : i32, i32
  }
  func.func @transform_1(%arg0: i32) -> (i32, i32) {
    %c0_i32 = arith.constant 0 : i32
    %c0_i32_0 = arith.constant 0 : i32
    %c0_i32_1 = arith.constant 0 : i32
    return %c0_i32, %c0_i32_0 : i32, i32
  }
  func.func @transform_2(%arg0: i32) -> (i32, i32) {
    %c0_i32 = arith.constant 0 : i32
    %c0_i32_0 = arith.constant 0 : i32
    return %arg0, %c0_i32 : i32, i32
  }
}

</mosaic_0001>

<bundles_post_ra>
// kernel: tpu_custom_call.1
= control target key start
LH: loop header
LB: loop body
LE: loop exit
PB: predicated region body
PF: predicated region fallthrough
CT: control target
= control target key end

     0   :  { %6 = vsyncpa [#allocation3], 0  ;;  %s124_s0 = inlined_call_operand.hbm [shape: f32[8,128], index: 0, kind: input, shape index: {}]   ;;  %s125_s1 = inlined_call_operand.hbm [shape: f32[8,128], index: 1, kind: output, shape index: {}]  }
   0x1   :  { %7 = vsyncpa [#allocation4], 0  ;;  %s88_s6 = smov [#allocation2]   ;;  %s40_s10 = scalar_lea.hbm %s124_s0, 128 }
   0x2   :  { %s14_s7 = sshll.u32 %s88_s6, 4  ;;  %p41_p0 = scmp.ne.s32.totalorder %s124_s0, %s40_s10  ;;  %s15_s7 = int_to_ptr.vmem [resolvable:$true] %s14_s7 }
   0x3   :  { %p44_p1 = scmp.lt.u32.totalorder %s40_s10, %s124_s0 }
   0x5   :  { %p46_p2 = pnand %p44_p1, %p41_p0 }
   0x7   :  { %49 = shalt.err (!%p46_p2)
}
   0x8   :  { %s50_s15 = scalar_lea.vmem %s15_s7, 128  ;;  %p55_p4 = scmp.lt.s32.totalorder %s15_s7, %s15_s7 }
   0x9   :  { %p51_p3 = scmp.ne.s32.totalorder %s15_s7, %s50_s15  ;;  %p56_p5 = scmp.lt.s32.totalorder %s50_s15, %s50_s15 }
   0xb   :  { %p57_p6 = por %p56_p5, %p55_p4 }
   0xd   :  { %p58_p7 = pnand %p57_p6, %p51_p3 }
   0xf   :  { %61 = shalt.err (!%p58_p7)
}
  0x10   :  { %17 = dma.hbm_to_vmem [thread:$0]  %s124_s0, 128, %s15_s7, [#allocation3]  }
  0x11   :  { %84 = dma.done.wait [#allocation3], 128  }
  0x12   :  { %85 = vsyncadd [#allocation3], 4294967168  ;;  %s89_s18 = smov [#allocation5]   ;;  %v21_v0 = vld [vmem:[#allocation2] sm:$0xff] }
  0x13   :  { %s29_s19 = sshll.u32 %s89_s18, 4  ;;  %22 = vst [vmem:[#allocation5] sm:$0xff] %v21_v0  ;;  %s30_s19 = int_to_ptr.vmem [resolvable:$true] %s29_s19 }
  0x14   :  { %s62_s20 = scalar_lea.vmem %s30_s19, 128  ;;  %p67_p9 = scmp.lt.s32.totalorder %s30_s19, %s30_s19 }
  0x15   :  { %p63_p8 = scmp.ne.s32.totalorder %s30_s19, %s62_s20  ;;  %p68_p10 = scmp.lt.s32.totalorder %s62_s20, %s62_s20 }
  0x17   :  { %p69_p11 = por %p68_p10, %p67_p9 }
  0x19   :  { %p70_p12 = pnand %p69_p11, %p63_p8 }
  0x1b   :  { %73 = shalt.err (!%p70_p12)
}
  0x1c   :  { %s74_s23 = scalar_lea.hbm %s125_s1, 128 }
  0x1d   :  { %p75_p13 = scmp.ne.s32.totalorder %s125_s1, %s74_s23  ;;  %p78_p0 = scmp.lt.u32.totalorder %s74_s23, %s125_s1 }
  0x1f   :  { %p80_p1 = pnand %p78_p0, %p75_p13 }
  0x21   :  { %83 = shalt.err (!%p80_p1)
}
  0x22   :  { %32 = dma.vmem_to_hbm [thread:$0]  %s30_s19, 128, %s125_s1, [#allocation4]  }
  0x23   :  { %86 = dma.done.wait [#allocation4], 128  }
  0x24   :  { %87 = vsyncadd [#allocation4], 4294967168 }
  0x25   :  { %36 = vsyncpa [#allocation3], 1 }
  0x26   :  { %37 = vsyncpa [#allocation4], 1 }

// kernel: squeeze.3
= control target key start
LH: loop header
LB: loop body
LE: loop exit
PB: predicated region body
PF: predicated region fallthrough
CT: control target
= control target key end

     0   :  { %s85_s0 = inlined_call_operand.vmem [shape: f32[16], index: 0, kind: input, shape index: {}]   ;;  %s86_s1 = inlined_call_operand.hbm [shape: f32[2,8], index: 1, kind: output, shape index: {}]  }
   0x1   :  { %v5_v0 = vld [vmem:[%s85_s0] sm:$0x1] }
   0x2   :  { %2 = vsyncpa [#allocation1], 0  ;;  %6 = vst [vmem:[#allocation3] sm:$0x1] %v5_v0  ;;  %vm8_vm0 = vcmask 64512   ;;  %s58_s0 = smov 120  }
   0x3   :  { %s59_s8 = smov [#allocation0]  }
   0x4   :  { %s26_s9 = sshll.u32 %s59_s8, 4  ;;  %s27_s9 = int_to_ptr.vmem [resolvable:$true] %s26_s9 }
   0x5   :  { %s34_s10 = scalar_lea.vmem %s27_s9, 32  ;;  %p39_p1 = scmp.lt.s32.totalorder %s27_s9, %s27_s9 }
   0x6   :  { %p35_p0 = scmp.ne.s32.totalorder %s27_s9, %s34_s10  ;;  %p40_p2 = scmp.lt.s32.totalorder %s34_s10, %s34_s10 }
   0x8   :  { %p41_p3 = por %p40_p2, %p39_p1 }
   0x9   :  { %v10_v1 = vld [vmem:[#allocation3] sm:$0x1]  }
   0xa   :  { %v7_v2 = vld [vmem:[#allocation3] sm:$0x1]   ;;  %11 = vrot.lane.b32.xlu0 %v10_v1, %s58_s0  ;;  %p42_p4 = pnand %p41_p3, %p35_p0 }
   0xb   :  { %9 = vst.msk [vmem:[#allocation2] sm:$0x1] %vm8_vm0, %v7_v2  }
  0x7c   :  { %v12_v3 = vpop.permute.xlu0 %11  }
  0x7d   :  { %15 = vst.msk [vmem:[#allocation2 + $0x1] sm:$0x1] %vm8_vm0, %v12_v3  }
  0x84   :  { %v19_v4 = vld [vmem:[#allocation2] sm:$0x3] }
  0x85   :  { %21 = vst [vmem:[#allocation0] sm:$0x3] %v19_v4 }
  0x86   :  { %45 = shalt.err (!%p42_p4)
}
  0x87   :  { %s46_s13 = scalar_lea.hbm %s86_s1, 32 }
  0x88   :  { %p47_p5 = scmp.ne.s32.totalorder %s86_s1, %s46_s13  ;;  %p50_p6 = scmp.lt.u32.totalorder %s46_s13, %s86_s1 }
  0x8a   :  { %p52_p7 = pnand %p50_p6, %p47_p5 }
  0x8c   :  { %55 = shalt.err (!%p52_p7)
}
  0x8d   :  { %29 = dma.vmem_to_hbm [thread:$0]  %s27_s9, 32, %s86_s1, [#allocation1]  }
  0x8e   :  { %56 = dma.done.wait [#allocation1], 32  }
  0x8f   :  { %57 = vsyncadd [#allocation1], 4294967264 }
  0x90   :  { %31 = vsyncpa [#allocation1], 1 }

// kernel: _forward.1
= control target key start
LH: loop header
LB: loop body
LE: loop exit
PB: predicated region body
PF: predicated region fallthrough
CT: control target
= control target key end

     0   :  { %7 = vsyncpa [#allocation3], 0  ;;  %s588_s9 = smov [#allocation2]   ;;  %s638_s0 = inlined_call_operand.vmem [shape: s32[16,1], index: 0, kind: input, shape index: {}]   ;;  %s639_s1 = inlined_call_operand.hbm [shape: bf16[384,256], index: 1, kind: input, shape index: {}]   ;;  %s640_s2 = inlined_call_operand.vmem [shape: f32[16,256], index: 2, kind: output, shape index: {}]  }
   0x1   :  { %s15_s10 = sshll.u32 %s588_s9, 4  ;;  %s564_s13 = scalar_lea.hbm %s639_s1, 6144  ;;  %s16_s10 = int_to_ptr.vmem [resolvable:$true] %s15_s10 }
   0x2   :  { %p565_p0 = scmp.ne.s32.totalorder %s639_s1, %s564_s13  ;;  %p568_p1 = scmp.lt.u32.totalorder %s564_s13, %s639_s1 }
   0x4   :  { %p570_p2 = pnand %p568_p1, %p565_p0 }
   0x6   :  { %573 = shalt.err (!%p570_p2)
}
   0x7   :  { %s574_s18 = scalar_lea.vmem %s16_s10, 6144  ;;  %p579_p4 = scmp.lt.s32.totalorder %s16_s10, %s16_s10 }
   0x8   :  { %p575_p3 = scmp.ne.s32.totalorder %s16_s10, %s574_s18  ;;  %p580_p5 = scmp.lt.s32.totalorder %s574_s18, %s574_s18 }
   0xa   :  { %p581_p6 = por %p580_p5, %p579_p4 }
   0xc   :  { %p582_p7 = pnand %p581_p6, %p575_p3 }
   0xe   :  { %585 = shalt.err (!%p582_p7)
}
   0xf   :  { %s589_s19 = smov 128   ;;  %s590_s20 = smov 8  }
  0x10   :  { %21 = dma.hbm_to_vmem [thread:$0]  %s639_s1, 6144, %s16_s10, [#allocation3], %s589_s19, %s589_s19, %s590_s20  }
  0x11   :  { %586 = dma.done.wait [#allocation3], 6144  }
  0x12   :  { %587 = vsyncadd [#allocation3], 4294961152  ;;  %v591_v0 = vmov 0   ;;  %v26_v1 = vld [vmem:[%s638_s0] sm:$0xff]  ;;  %v27_v2 = vld [vmem:[%s638_s0 + $0x8] sm:$0xff]  ;;  %v28_v51 = vlaneseq }
  0x13   :  { %491 = vset.pattern.permute.xlu0 %v591_v0  ;;  %406 = vmatprep.mubr.bf16.mxu0 %v591_v0  ;;  %v492_v3 = vld [vmem:[#allocation2 + $0x4] ss:$8 sps:$4 sm:$0xff]   ;;  %v494_v4 = vld [vmem:[#allocation2] ss:$8 sps:$4 sm:$0xff]   ;;  %v495_v5 = vld [vmem:[#allocation2 + $0x14] ss:$8 sps:$4 sm:$0xff]  }
  0x14   :  { %31 = vperm.xlu0 %491, %v26_v1   ;;  %331 = vmatprep.subr.bf16.mxu1 %v492_v3  ;;  %v497_v6 = vld [vmem:[#allocation2 + $0x10] ss:$8 sps:$4 sm:$0xff]   ;;  %v498_v7 = vld [vmem:[#allocation2 + $0x24] ss:$8 sps:$4 sm:$0xff]   ;;  %v500_v8 = vld [vmem:[#allocation2 + $0x20] ss:$8 sps:$4 sm:$0xff]  }
  0x15   :  { %332 = vmatpush1.bf16.msra.mxu1 %v494_v4  ;;  %v501_v9 = vld [vmem:[#allocation2 + $0x34] ss:$8 sps:$4 sm:$0xff]   ;;  %v503_v10 = vld [vmem:[#allocation2 + $0x30] ss:$8 sps:$4 sm:$0xff]   ;;  %v516_v11 = vld [vmem:[#allocation2 + $0x104] ss:$8 sps:$4 sm:$0xff]  }
  0x16   :  { %333 = vmatprep.subr.bf16.mxu1 %v495_v5  ;;  %v504_v12 = vld [vmem:[#allocation2 + $0x44] ss:$8 sps:$4 sm:$0xff]   ;;  %v520_v13 = vld [vmem:[#allocation2 + $0x100] ss:$8 sps:$4 sm:$0xff]   ;;  %374 = vmatprep.subr.bf16.mxu0 %v516_v11  ;;  %v522_v14 = vld [vmem:[#allocation2 + $0x114] ss:$8 sps:$4 sm:$0xff]  }
  0x17   :  { %v506_v15 = vld [vmem:[#allocation2 + $0x40] ss:$8 sps:$4 sm:$0xff]   ;;  %375 = vmatpush1.bf16.msra.mxu0 %v520_v13  ;;  %v507_v16 = vld [vmem:[#allocation2 + $0x54] ss:$8 sps:$4 sm:$0xff]   ;;  %v526_v17 = vld [vmem:[#allocation2 + $0x110] ss:$8 sps:$4 sm:$0xff]  }
  0x18   :  { %34 = vperm.xlu0 %491, %v27_v2   ;;  %376 = vmatprep.subr.bf16.mxu0 %v522_v14  ;;  %v528_v18 = vld [vmem:[#allocation2 + $0x124] ss:$8 sps:$4 sm:$0xff]   ;;  %v509_v19 = vld [vmem:[#allocation2 + $0x50] ss:$8 sps:$4 sm:$0xff]   ;;  %v532_v20 = vld [vmem:[#allocation2 + $0x120] ss:$8 sps:$4 sm:$0xff]  }
  0x19   :  { %334 = vmatpush1.bf16.msra.mxu1 %v497_v6  ;;  %v534_v21 = vld [vmem:[#allocation2 + $0x134] ss:$8 sps:$4 sm:$0xff]   ;;  %v510_v22 = vld [vmem:[#allocation2 + $0x64] ss:$8 sps:$4 sm:$0xff]   ;;  %v538_v23 = vld [vmem:[#allocation2 + $0x130] ss:$8 sps:$4 sm:$0xff]  }
  0x1a   :  { %335 = vmatprep.subr.bf16.mxu1 %v498_v7  ;;  %v512_v24 = vld [vmem:[#allocation2 + $0x60] ss:$8 sps:$4 sm:$0xff]   ;;  %v540_v25 = vld [vmem:[#allocation2 + $0x144] ss:$8 sps:$4 sm:$0xff]   ;;  %v513_v26 = vld [vmem:[#allocation2 + $0x74] ss:$8 sps:$4 sm:$0xff]  }
  0x1b   :  { %377 = vmatpush1.bf16.msra.mxu0 %v526_v17  ;;  %v515_v27 = vld [vmem:[#allocation2 + $0x70] ss:$8 sps:$4 sm:$0xff]   ;;  %v544_v28 = vld [vmem:[#allocation2 + $0x140] ss:$8 sps:$4 sm:$0xff]   ;;  %v546_v29 = vld [vmem:[#allocation2 + $0x154] ss:$8 sps:$4 sm:$0xff]  }
  0x1c   :  { %378 = vmatprep.subr.bf16.mxu0 %v528_v18  ;;  %v518_v30 = vld [vmem:[#allocation2 + $0x84] ss:$8 sps:$4 sm:$0xff]   ;;  %v550_v31 = vld [vmem:[#allocation2 + $0x150] ss:$8 sps:$4 sm:$0xff]   ;;  %v521_v32 = vld [vmem:[#allocation2 + $0x80] ss:$8 sps:$4 sm:$0xff]  }
  0x1d   :  { %336 = vmatpush1.bf16.msra.mxu1 %v500_v8  ;;  %v552_v33 = vld [vmem:[#allocation2 + $0x164] ss:$8 sps:$4 sm:$0xff]   ;;  %v524_v34 = vld [vmem:[#allocation2 + $0x94] ss:$8 sps:$4 sm:$0xff]   ;;  %v556_v35 = vld [vmem:[#allocation2 + $0x160] ss:$8 sps:$4 sm:$0xff]  }
  0x1e   :  { %337 = vmatprep.subr.bf16.mxu1 %v501_v9  ;;  %v527_v36 = vld [vmem:[#allocation2 + $0x90] ss:$8 sps:$4 sm:$0xff]   ;;  %v558_v37 = vld [vmem:[#allocation2 + $0x174] ss:$8 sps:$4 sm:$0xff]   ;;  %v530_v38 = vld [vmem:[#allocation2 + $0xa4] ss:$8 sps:$4 sm:$0xff]  }
  0x1f   :  { %379 = vmatpush1.bf16.msra.mxu0 %v532_v20  ;;  %v562_v39 = vld [vmem:[#allocation2 + $0x170] ss:$8 sps:$4 sm:$0xff]   ;;  %v533_v40 = vld [vmem:[#allocation2 + $0xa0] ss:$8 sps:$4 sm:$0xff]   ;;  %v536_v41 = vld [vmem:[#allocation2 + $0xb4] ss:$8 sps:$4 sm:$0xff]  }
  0x20   :  { %380 = vmatprep.subr.bf16.mxu0 %v534_v21  ;;  %v539_v42 = vld [vmem:[#allocation2 + $0xb0] ss:$8 sps:$4 sm:$0xff]   ;;  %v542_v43 = vld [vmem:[#allocation2 + $0xc4] ss:$8 sps:$4 sm:$0xff]   ;;  %v545_v44 = vld [vmem:[#allocation2 + $0xc0] ss:$8 sps:$4 sm:$0xff]  }
  0x21   :  { %338 = vmatpush1.bf16.msra.mxu1 %v503_v10  ;;  %v548_v45 = vld [vmem:[#allocation2 + $0xd4] ss:$8 sps:$4 sm:$0xff]   ;;  %v551_v46 = vld [vmem:[#allocation2 + $0xd0] ss:$8 sps:$4 sm:$0xff]   ;;  %v554_v47 = vld [vmem:[#allocation2 + $0xe4] ss:$8 sps:$4 sm:$0xff]  }
  0x22   :  { %339 = vmatprep.subr.bf16.mxu1 %v504_v12  ;;  %v557_v48 = vld [vmem:[#allocation2 + $0xe0] ss:$8 sps:$4 sm:$0xff]   ;;  %v560_v49 = vld [vmem:[#allocation2 + $0xf4] ss:$8 sps:$4 sm:$0xff]   ;;  %v563_v50 = vld [vmem:[#allocation2 + $0xf0] ss:$8 sps:$4 sm:$0xff]  }
  0x23   :  { %381 = vmatpush1.bf16.msra.mxu0 %v538_v23  ;;  %v29_v53 = vand.u32 127, %v28_v51  ;;  %v592_v55 = vmov 1.0|1.0  }
  0x24   :  { %382 = vmatprep.subr.bf16.mxu0 %v540_v25 }
  0x25   :  { %340 = vmatpush1.bf16.msra.mxu1 %v506_v15 }
  0x26   :  { %341 = vmatprep.subr.bf16.mxu1 %v507_v16 }
  0x27   :  { %383 = vmatpush1.bf16.msra.mxu0 %v544_v28 }
  0x28   :  { %384 = vmatprep.subr.bf16.mxu0 %v546_v29 }
  0x29   :  { %342 = vmatpush1.bf16.msra.mxu1 %v509_v19 }
  0x2a   :  { %343 = vmatprep.subr.bf16.mxu1 %v510_v22 }
  0x2b   :  { %385 = vmatpush1.bf16.msra.mxu0 %v550_v31 }
  0x2c   :  { %386 = vmatprep.subr.bf16.mxu0 %v552_v33 }
  0x2d   :  { %344 = vmatpush1.bf16.msra.mxu1 %v512_v24 }
  0x2e   :  { %345 = vmatprep.subr.bf16.mxu1 %v513_v26 }
  0x2f   :  { %387 = vmatpush1.bf16.msra.mxu0 %v556_v35 }
  0x30   :  { %388 = vmatprep.subr.bf16.mxu0 %v558_v37 }
  0x31   :  { %346 = vmatpush1.bf16.msra.mxu1 %v515_v27 }
  0x32   :  { %347 = vmatprep.subr.bf16.mxu1 %v518_v30 }
  0x33   :  { %389 = vmatpush1.bf16.msra.mxu0 %v562_v39 }
  0x35   :  { %348 = vmatpush1.bf16.msra.mxu1 %v521_v32 }
  0x36   :  { %349 = vmatprep.subr.bf16.mxu1 %v524_v34 }
  0x39   :  { %350 = vmatpush1.bf16.msra.mxu1 %v527_v36 }
  0x3a   :  { %351 = vmatprep.subr.bf16.mxu1 %v530_v38 }
  0x3d   :  { %352 = vmatpush1.bf16.msra.mxu1 %v533_v40 }
  0x3e   :  { %353 = vmatprep.subr.bf16.mxu1 %v536_v41 }
  0x41   :  { %354 = vmatpush1.bf16.msra.mxu1 %v539_v42 }
  0x42   :  { %355 = vmatprep.subr.bf16.mxu1 %v542_v43 }
  0x45   :  { %356 = vmatpush1.bf16.msra.mxu1 %v545_v44 }
  0x46   :  { %357 = vmatprep.subr.bf16.mxu1 %v548_v45 }
  0x49   :  { %358 = vmatpush1.bf16.msra.mxu1 %v551_v46 }
  0x4a   :  { %359 = vmatprep.subr.bf16.mxu1 %v554_v47 }
  0x4d   :  { %360 = vmatpush1.bf16.msra.mxu1 %v557_v48 }
  0x4e   :  { %361 = vmatprep.subr.bf16.mxu1 %v560_v49 }
  0x51   :  { %362 = vmatpush1.bf16.msra.mxu1 %v563_v50 }
  0x93   :  { %v32_v52 = vpop.permute.xlu0 %31 }
  0x94   :  { %vm36_vm0 = vcmp.eq.s32.totalorder %v29_v53, %v32_v52 }
  0x97   :  { %v35_v54 = vpop.permute.xlu0 %34 }
  0x98   :  { %vm37_vm1 = vcmp.eq.s32.totalorder %v29_v53, %v35_v54 }
  0x99   :  { %vm476_vm2 = vmpackc.low %vm37_vm1, %vm36_vm0 }
  0x9a   :  { %477 = vmatprep.mubr.msk.bf16.mxu1 %vm476_vm2, %v592_v55  ;;  %481 = vmatmul.mubr.msk.bf16.vlgmr.msra.gmra.mrb[0].mxu0 %vm476_vm2, %v592_v55 }
  0x9b   :  { %479 = vmatmul.mubr.msk.bf16.vlgmr.msra.gmra.mrb[0].mxu1 %vm476_vm2, %v592_v55 }
 0x16d   :  { %v408_v56 = vpop.f32.mrb[0].mxu0 }
 0x16e   :  { %v365_v57 = vpop.f32.mrb[0].mxu1  ;;  %v410_v58 = vpop.f32.mrb[1].mxu0 }
 0x16f   :  { %v409_v59 = vadd.f32 %v408_v56, %v365_v57  ;;  %v367_v60 = vpop.f32.mrb[1].mxu1  ;;  %v412_v61 = vpop.f32.mrb[2].mxu0 }
 0x170   :  { %v411_v62 = vadd.f32 %v410_v58, %v367_v60  ;;  %v369_v63 = vpop.f32.mrb[2].mxu1  ;;  %v414_v0 = vpop.f32.mrb[3].mxu0 }
 0x171   :  { %417 = vst [vmem:[%s640_s2] sm:$0xff] %v409_v59  ;;  %v413_v1 = vadd.f32 %v412_v61, %v369_v63  ;;  %v371_v2 = vpop.f32.mrb[3].mxu1 }
 0x172   :  { %418 = vst [vmem:[%s640_s2 + $0x8] sm:$0xff] %v411_v62  ;;  %v415_v3 = vadd.f32 %v414_v0, %v371_v2 }
 0x173   :  { %419 = vst [vmem:[%s640_s2 + $0x10] sm:$0xff] %v413_v1 }
 0x174   :  { %420 = vst [vmem:[%s640_s2 + $0x18] sm:$0xff] %v415_v3 }
 0x175   :  { %425 = vsyncpa [#allocation3], 1 }

</bundles_post_ra>
